<compile_context>
chip_gen: v7x
topology: tpu7x:2x2x1
jax: 0.10.0
libtpu: 0.0.40
codegen_flags: <defaults>
</compile_context>

<pallas_src>
import jax
import jax.numpy as jnp
from jax.experimental import pallas as pl
from jax.experimental.pallas import tpu as pltpu

LANE = 128                          # lane width: last-dim padding target for the output
VMEM_LIMIT_BYTES = 32 * 1024 * 1024 # safe everywhere (v5e/v6e 128 MiB, v7x 64 MiB physical)
ACT_VMEM_BUDGET = 8 * 1024 * 1024   # rough budget for live activations when sizing tiles


def _round_up(n: int, m: int) -> int:
    return ((n + m - 1) // m) * m


def _num_tensorcores() -> int:
    """TensorCores per chip (2 on 2-TC chips like v7x, else 1). Best-effort."""
    try:
        dev = jax.devices()[0]
        for attr in ("num_cores", "core_count", "num_tensorcores"):
            v = getattr(dev, attr, None)
            if isinstance(v, int) and v > 0:
                return v
    except Exception:
        pass
    return 1


def _make_mlp_kernel(num_layers: int):
    """Fused L-layer MLP kernel: ReLU(...ReLU(x@W1+b1)...)@WL+bL on one tile.

    Ref order: x, (W1, b1), ..., (WL, bL), out.
      x   : (Bt, obs)      activations (f32 or bf16), natural feature width.
      Wi  : (in_i, out_i)  natural shapes; last layer out-dim padded to 128.
      bi  : (1, out_i)     always f32.
      out : (Bt, 128-pad)  f32/bf16 lane-dense output (real actions in cols [:A]).
    """
    def kernel(*refs):
        x_ref, out_ref = refs[0], refs[-1]
        h = x_ref[...]
        for i in range(num_layers):                      # static loop, L is tiny
            w = refs[1 + 2 * i][...]
            b = refs[2 + 2 * i][...]                     # (1, out) f32
            y = jnp.dot(h, w, preferred_element_type=jnp.float32) + b   # MXU + VPU
            if i < num_layers - 1:
                h = jnp.maximum(y, 0.0).astype(w.dtype)  # f32 ReLU, cast for next MXU op
            else:
                h = y                                    # no activation on the last layer
        out_ref[...] = h.astype(out_ref.dtype)
    return kernel


def pack_dqn_params(params, mxu_dtype=jnp.bfloat16):
    """Pack per-layer (W, b) once and reuse.

    Weights stay at their natural (in, out) shapes (no K inflation); only the
    last layer's output dim is zero-padded to 128 lanes so the kernel's output
    store is lane-dense.  Biases are kept in f32 (the bias-add/ReLU run in f32).
    """
    L = len(params)
    weights, biases = [], []
    for i, (w, b) in enumerate(params):
        w = jnp.asarray(w, jnp.float32)
        b = jnp.asarray(b, jnp.float32).reshape(1, -1)
        if i == L - 1:
            pad = _round_up(w.shape[1], LANE) - w.shape[1]
            if pad:
                w = jnp.pad(w, ((0, 0), (0, pad)))
                b = jnp.pad(b, ((0, 0), (0, pad)))
        weights.append(w.astype(mxu_dtype))
        biases.append(b)
    return weights, biases


def dqn_apply(x, weights, biases, action_count, *,
              out_dtype=jnp.float32, max_rows_per_tile=None):
    """Run the packed DQN forward pass through one pallas_call."""
    batch, obs = x.shape
    L = len(weights)
    mxu_dtype = weights[0].dtype
    out_lanes = weights[-1].shape[1]                    # already padded to 128
    row_align = 16 if mxu_dtype == jnp.bfloat16 else 8  # bf16 packs 16 rows / vreg

    # --- tile sizing: as few grid steps as possible ---------------------------
    if max_rows_per_tile is None:
        widest = max([obs] + [w.shape[1] for w in weights])
        max_rows_per_tile = max(256, min(4096, ACT_VMEM_BUDGET // (16 * widest)))
    max_rows_per_tile = max(row_align, (max_rows_per_tile // row_align) * row_align)

    n_cores = _num_tensorcores()
    n_tiles = max(n_cores, pl.cdiv(batch, max_rows_per_tile))
    n_tiles = _round_up(n_tiles, n_cores)               # balanced across TensorCores
    tile = _round_up(pl.cdiv(batch, n_tiles), row_align)
    tile = min(tile, max_rows_per_tile)
    padded_batch = _round_up(batch, tile)
    grid_len = padded_batch // tile

    # --- prepare x: cast (bf16 halves DMA bytes), pad only the row count ------
    xk = x.astype(mxu_dtype)
    if padded_batch != batch:
        xk = jnp.pad(xk, ((0, padded_batch - batch), (0, 0)))

    kernel = _make_mlp_kernel(L)
    out_shape = jax.ShapeDtypeStruct((padded_batch, out_lanes), out_dtype)
    vmem = pltpu.MemorySpace.VMEM

    operands = [xk]
    for w, b in zip(weights, biases):
        operands += [w, b]

    if grid_len == 1:
        # Whole problem is a single VMEM-resident block: no grid, no per-step
        # pipeline overhead.  Best case on 1-TensorCore chips (v5e/v6e).
        full = lambda: pl.BlockSpec(memory_space=vmem)
        out = pl.pallas_call(
            kernel,
            out_shape=out_shape,
            in_specs=[full() for _ in operands],
            out_specs=full(),
            compiler_params=pltpu.CompilerParams(
                vmem_limit_bytes=VMEM_LIMIT_BYTES),
        )(*operands)
    else:
        # Batch split into n_tiles blocks (a multiple of the TensorCore count);
        # "parallel" lets Mosaic shard the row blocks across both cores on
        # 2-TC chips and pipeline them elsewhere.
        in_specs = [pl.BlockSpec((tile, obs), lambda i: (i, 0), memory_space=vmem)]
        for w, b in zip(weights, biases):
            # Constant index_map => never re-fetched between grid steps.
            in_specs.append(pl.BlockSpec(w.shape, lambda i: (0, 0), memory_space=vmem))
            in_specs.append(pl.BlockSpec(b.shape, lambda i: (0, 0), memory_space=vmem))
        out = pl.pallas_call(
            kernel,
            out_shape=out_shape,
            grid=(grid_len,),
            in_specs=in_specs,
            out_specs=pl.BlockSpec((tile, out_lanes), lambda i: (i, 0),
                                   memory_space=vmem),
            compiler_params=pltpu.CompilerParams(
                dimension_semantics=("parallel",),
                vmem_limit_bytes=VMEM_LIMIT_BYTES),
        )(*operands)

    return out[:batch, :action_count]


def dqn_forward(x, params, mxu_dtype=jnp.bfloat16, out_dtype=jnp.float32):
    """Convenience wrapper: pack params + apply (pack once & reuse in real use)."""
    weights, biases = pack_dqn_params(params, mxu_dtype)
    action_count = params[-1][0].shape[1]
    return dqn_apply(x, weights, biases, action_count, out_dtype=out_dtype)


def init_dqn_params(key, observation_size, hidden_layers, action_count):
    """Deterministic PyTorch-style (kaiming-uniform) init for nn.Linear."""
    node_counts = [observation_size, *hidden_layers, action_count]
    params = []
    for i in range(len(node_counts) - 1):
        fan_in, fan_out = node_counts[i], node_counts[i + 1]
        key, kw, kb = jax.random.split(key, 3)
        bound = 1.0 / (fan_in ** 0.5)
        # Stored as (in, out) so the kernel does x @ W directly.
        w = jax.random.uniform(kw, (fan_in, fan_out), jnp.float32, -bound, bound)
        b = jax.random.uniform(kb, (fan_out,), jnp.float32, -bound, bound)
        params.append((w, b))
    return params


def dqn_forward_reference(x, params):
    """Pure-JAX reference for correctness checking."""
    h = x
    for (w, b) in params[:-1]:
        h = jnp.maximum(h @ w + b, 0.0)
    w, b = params[-1]
    return h @ w + b


# TODO(synk): select_action (host-side epsilon-greedy RNG / env sampling),
# update() (loss/optimizer) and soft_update() are training-loop logic, not part
# of forward(); a fused in-kernel argmax/max-Q head would serve select_action
# but is out of scope here.

if __name__ == "__main__":
    key = jax.random.PRNGKey(0)

    # Small, CartPole-like DQN config.
    batch = 8
    observation_size = 4
    hidden_layers = [32, 32]
    action_count = 2

    key, kx = jax.random.split(key)
    x = jax.random.normal(kx, (batch, observation_size), jnp.float32)
    params = init_dqn_params(key, observation_size, hidden_layers, action_count)

    q_ref = dqn_forward_reference(x, params)

    # 1) f32 MXU-operand path (tight tolerance).
    q = jax.block_until_ready(dqn_forward(x, params, mxu_dtype=jnp.float32))
    assert q.shape == (batch, action_count)
    assert jnp.allclose(q, q_ref, atol=1e-4, rtol=1e-4), "f32 mismatch vs reference"

    # 2) Default path: bf16 MXU operands, f32 accumulation (looser tolerance).
    q_bf16 = jax.block_until_ready(dqn_forward(x, params))
    assert jnp.allclose(q_bf16, q_ref, atol=5e-2, rtol=5e-2), "bf16 mismatch"

    # 3) Replay-batch path (512 rows): one block on 1-TC chips, 2-way split on
    #    2-TC chips -- either way, far fewer grid steps than before.
    key, kx2 = jax.random.split(key)
    x_big = jax.random.normal(kx2, (512, observation_size), jnp.float32)
    w_f32, b_f32 = pack_dqn_params(params, mxu_dtype=jnp.float32)
    q_big = jax.block_until_ready(dqn_apply(x_big, w_f32, b_f32, action_count))
    q_big_ref = dqn_forward_reference(x_big, params)
    assert q_big.shape == (512, action_count)
    assert jnp.allclose(q_big, q_big_ref, atol=1e-4, rtol=1e-4), "batched mismatch"

    # 4) Force the multi-step pipelined grid path (tile cap = 128 -> 4 steps).
    q_grid = jax.block_until_ready(
        dqn_apply(x_big, w_f32, b_f32, action_count, max_rows_per_tile=128))
    assert jnp.allclose(q_grid, q_big_ref, atol=1e-4, rtol=1e-4), "grid-path mismatch"

    print("KERNEL_OK")
</pallas_src>

<mosaic_0001>
module attributes {stable_mosaic.version = 11 : i64} {
  func.func @kernel(%arg0: memref<8x4xf32, #tpu.memory_space<vmem>>, %arg1: memref<4x32xf32, #tpu.memory_space<vmem>>, %arg2: memref<1x32xf32, #tpu.memory_space<vmem>>, %arg3: memref<32x32xf32, #tpu.memory_space<vmem>>, %arg4: memref<1x32xf32, #tpu.memory_space<vmem>>, %arg5: memref<32x128xf32, #tpu.memory_space<vmem>>, %arg6: memref<1x128xf32, #tpu.memory_space<vmem>>, %arg7: memref<8x128xf32, #tpu.memory_space<vmem>>) attributes {dimension_semantics = [], scalar_prefetch = 0 : i64, scratch_operands = 0 : i64, tpu.core_type = #tpu.core_type<tc>} {
    %c0 = arith.constant 0 : index
    %c0_0 = arith.constant 0 : index
    %0 = vector.load %arg0[%c0, %c0_0] : memref<8x4xf32, #tpu.memory_space<vmem>>, vector<8x4xf32>
    %c0_1 = arith.constant 0 : index
    %c0_2 = arith.constant 0 : index
    %1 = vector.load %arg1[%c0_1, %c0_2] : memref<4x32xf32, #tpu.memory_space<vmem>>, vector<4x32xf32>
    %c0_3 = arith.constant 0 : index
    %c0_4 = arith.constant 0 : index
    %2 = vector.load %arg2[%c0_3, %c0_4] : memref<1x32xf32, #tpu.memory_space<vmem>>, vector<1x32xf32>
    %cst = arith.constant dense<0.000000e+00> : vector<8x32xf32>
    %3 = tpu.matmul %0, %1, %cst {dimension_numbers = #tpu.dot_dimension_numbers<[1], [0], [0], [1], [0, 0, 1, 1], [], []>} : vector<8x4xf32>, vector<4x32xf32>, vector<8x32xf32> -> vector<8x32xf32>
    %4 = vector.broadcast %2 : vector<1x32xf32> to vector<8x32xf32>
    %5 = arith.addf %3, %4 : vector<8x32xf32>
    %cst_5 = arith.constant 0.000000e+00 : f32
    %6 = vector.broadcast %cst_5 : f32 to vector<8x32xf32>
    %7 = arith.maximumf %5, %6 : vector<8x32xf32>
    %c0_6 = arith.constant 0 : index
    %c0_7 = arith.constant 0 : index
    %8 = vector.load %arg3[%c0_6, %c0_7] : memref<32x32xf32, #tpu.memory_space<vmem>>, vector<32x32xf32>
    %c0_8 = arith.constant 0 : index
    %c0_9 = arith.constant 0 : index
    %9 = vector.load %arg4[%c0_8, %c0_9] : memref<1x32xf32, #tpu.memory_space<vmem>>, vector<1x32xf32>
    %cst_10 = arith.constant dense<0.000000e+00> : vector<8x32xf32>
    %10 = tpu.matmul %7, %8, %cst_10 {dimension_numbers = #tpu.dot_dimension_numbers<[1], [0], [0], [1], [0, 0, 1, 1], [], []>} : vector<8x32xf32>, vector<32x32xf32>, vector<8x32xf32> -> vector<8x32xf32>
    %11 = vector.broadcast %9 : vector<1x32xf32> to vector<8x32xf32>
    %12 = arith.addf %10, %11 : vector<8x32xf32>
    %cst_11 = arith.constant 0.000000e+00 : f32
    %13 = vector.broadcast %cst_11 : f32 to vector<8x32xf32>
    %14 = arith.maximumf %12, %13 : vector<8x32xf32>
    %c0_12 = arith.constant 0 : index
    %c0_13 = arith.constant 0 : index
    %15 = vector.load %arg5[%c0_12, %c0_13] : memref<32x128xf32, #tpu.memory_space<vmem>>, vector<32x128xf32>
    %c0_14 = arith.constant 0 : index
    %c0_15 = arith.constant 0 : index
    %16 = vector.load %arg6[%c0_14, %c0_15] : memref<1x128xf32, #tpu.memory_space<vmem>>, vector<1x128xf32>
    %cst_16 = arith.constant dense<0.000000e+00> : vector<8x128xf32>
    %17 = tpu.matmul %14, %15, %cst_16 {dimension_numbers = #tpu.dot_dimension_numbers<[1], [0], [0], [1], [0, 0, 1, 1], [], []>} : vector<8x32xf32>, vector<32x128xf32>, vector<8x128xf32> -> vector<8x128xf32>
    %18 = vector.broadcast %16 : vector<1x128xf32> to vector<8x128xf32>
    %19 = arith.addf %17, %18 : vector<8x128xf32>
    %c0_17 = arith.constant 0 : index
    %c0_18 = arith.constant 0 : index
    %20 = vector.load %arg7[%c0_17, %c0_18] : memref<8x128xf32, #tpu.memory_space<vmem>>, vector<8x128xf32>
    tpu.vector_store %arg7[%c0_17, %c0_18], %19 {strides = array<i32>} : memref<8x128xf32, #tpu.memory_space<vmem>>, vector<8x128xf32>,
    return
  }
}

</mosaic_0001>

<bundles_post_ra>
// kernel: tpu_custom_call.1
= control target key start
LH: loop header
LB: loop body
LE: loop exit
PB: predicated region body
PF: predicated region fallthrough
CT: control target
= control target key end

     0   :  { %12 = vsyncpa [#allocation3], 0  ;;  %s567_s0 = inlined_call_operand.vmem [shape: f32[8,4], index: 0, kind: input, shape index: {}]   ;;  %s568_s1 = inlined_call_operand.vmem [shape: f32[4,32], index: 1, kind: input, shape index: {}]   ;;  %s569_s2 = inlined_call_operand.vmem [shape: f32[1,32], index: 2, kind: input, shape index: {}]   ;;  %s570_s3 = inlined_call_operand.hbm [shape: f32[32,32], index: 3, kind: input, shape index: {}]   ;;  %s571_s4 = inlined_call_operand.vmem [shape: f32[1,32], index: 4, kind: input, shape index: {}]   ;;  %s572_s5 = inlined_call_operand.hbm [shape: f32[32,128], index: 5, kind: input, shape index: {}]   ;;  %s573_s6 = inlined_call_operand.vmem [shape: f32[1,128], index: 6, kind: input, shape index: {}]   ;;  %s574_s7 = inlined_call_operand.hbm [shape: f32[8,128], index: 7, kind: output, shape index: {}]  }
   0x1   :  { %13 = vsyncpa [#allocation6], 0 }
   0x2   :  { %14 = vsyncpa [#allocation4], 0  ;;  %s468_s24 = smov [#allocation2]   ;;  %s396_s28 = scalar_lea.hbm %s570_s3, 512 }
   0x3   :  { %s26_s25 = sshll.u32 %s468_s24, 4  ;;  %p397_p0 = scmp.ne.s32.totalorder %s570_s3, %s396_s28  ;;  %s27_s25 = int_to_ptr.vmem [resolvable:$true] %s26_s25 }
   0x4   :  { %p400_p1 = scmp.lt.u32.totalorder %s396_s28, %s570_s3 }
   0x6   :  { %p402_p2 = pnand %p400_p1, %p397_p0 }
   0x8   :  { %405 = shalt.err (!%p402_p2)
}
   0x9   :  { %s406_s10 = scalar_lea.vmem %s27_s25, 512  ;;  %p411_p4 = scmp.lt.s32.totalorder %s27_s25, %s27_s25 }
   0xa   :  { %p407_p3 = scmp.ne.s32.totalorder %s27_s25, %s406_s10  ;;  %p412_p5 = scmp.lt.s32.totalorder %s406_s10, %s406_s10 }
   0xc   :  { %p413_p6 = por %p412_p5, %p411_p4 }
   0xe   :  { %p414_p7 = pnand %p413_p6, %p407_p3 }
  0x10   :  { %417 = shalt.err (!%p414_p7)
}
  0x11   :  { %s469_s11 = smov 128   ;;  %s470_s12 = smov 8  }
  0x12   :  { %32 = dma.hbm_to_vmem [thread:$0]  %s570_s3, 512, %s27_s25, [#allocation3], %s469_s11, %s469_s11, %s470_s12  }
  0x13   :  { %s471_s15 = smov [#allocation5]   ;;  %s418_s19 = scalar_lea.hbm %s572_s5, 512 }
  0x14   :  { %s40_s16 = sshll.u32 %s471_s15, 4  ;;  %p419_p8 = scmp.ne.s32.totalorder %s572_s5, %s418_s19  ;;  %s41_s16 = int_to_ptr.vmem [resolvable:$true] %s40_s16 }
  0x15   :  { %p422_p9 = scmp.lt.u32.totalorder %s418_s19, %s572_s5 }
  0x17   :  { %p424_p10 = pnand %p422_p9, %p419_p8 }
  0x19   :  { %427 = shalt.err (!%p424_p10)
}
  0x1a   :  { %s428_s24 = scalar_lea.vmem %s41_s16, 512  ;;  %p433_p12 = scmp.lt.s32.totalorder %s41_s16, %s41_s16 }
  0x1b   :  { %p429_p11 = scmp.ne.s32.totalorder %s41_s16, %s428_s24  ;;  %p434_p13 = scmp.lt.s32.totalorder %s428_s24, %s428_s24 }
  0x1d   :  { %p435_p0 = por %p434_p13, %p433_p12 }
  0x1f   :  { %p436_p1 = pnand %p435_p0, %p429_p11 }
  0x21   :  { %439 = shalt.err (!%p436_p1)
}
  0x22   :  { %46 = dma.hbm_to_vmem [thread:$0]  %s572_s5, 512, %s41_s16, [#allocation6], %s469_s11, %s469_s11, %s470_s12  }
  0x23   :  { %462 = dma.done.wait [#allocation3], 512  }
  0x24   :  { %463 = vsyncadd [#allocation3], 4294966784 }
  0x25   :  { %464 = dma.done.wait [#allocation6], 512  }
  0x26   :  { %465 = vsyncadd [#allocation6], 4294966784  ;;  %v472_v0 = vmov 0.0   ;;  %vm473_vm0 = vmmov 0   ;;  %v474_v1 = vmov 0.0|0.0   ;;  %vm68_vm1 = vcmask 1043456  }
  0x27   :  { %349 = vmatprep.subr.mxu0 %v472_v0  ;;  %351 = vmatprep.mubr.msk.f32.mxu0 %vm473_vm0, %v472_v0  ;;  %vm64_vm2 = vcmask 31744   ;;  %v56_v2 = vld [vmem:[%s568_s1] sm:$0xf]  ;;  %v144_v5 = vld [vmem:[#allocation2 + $0x8] sm:$0xff]  ;;  %v145_v7 = vld [vmem:[#allocation2 + $0x10] sm:$0xff]  ;;  %vm154_vm3 = vcmask 261120  }
  0x28   :  { %376 = vmatprep.subr.bf16.mxu1 %v474_v1  ;;  %362 = vmatprep.mubr.msk.f32.mxu1 %vm473_vm0, %v472_v0  ;;  %v55_v3 = vld [vmem:[%s567_s0] sm:$0xff]  ;;  %v146_v8 = vld [vmem:[#allocation2 + $0x18] sm:$0xff]  ;;  %v230_v11 = vld [vmem:[#allocation5 + $0x8] sm:$0xff]  ;;  %s475_s9 = smov [#allocation7]  }
  0x29   :  { %v143_v4 = vld [vmem:[#allocation2] sm:$0xff]  ;;  %350 = vmatpush3.msk.msra.mxu0 %vm68_vm1, %v56_v2  ;;  %v380_v9 = vpack.c.bf16 %v146_v8, %v145_v7  ;;  %v231_v18 = vld [vmem:[#allocation5 + $0x10] sm:$0xff]  ;;  %v232_v19 = vld [vmem:[#allocation5 + $0x18] sm:$0xff]  ;;  %s320_s10 = sshll.u32 %s475_s9, 4  ;;  %s321_s10 = int_to_ptr.vmem [resolvable:$true] %s320_s10 }
  0x2a   :  { %352 = vmatmul.mubr.msk.f32.vlgmr.msra.gmra.mrb[0].mxu0 %vm64_vm2, %v55_v3  ;;  %v377_v6 = vpack.c.bf16 %v144_v5, %v143_v4  ;;  %382 = vmatprep.subr.bf16.mxu0 %v474_v1  ;;  %v229_v10 = vld [vmem:[#allocation5] sm:$0xff]  ;;  %v386_v20 = vpack.c.bf16 %v232_v19, %v231_v18  ;;  %s440_s11 = scalar_lea.vmem %s321_s10, 128  ;;  %p445_p3 = scmp.lt.s32.totalorder %s321_s10, %s321_s10 }
  0x2b   :  { %373 = vmatprep.mubr.msk.f32.mxu0 %vm473_vm0, %v472_v0  ;;  %v383_v12 = vpack.c.bf16 %v230_v11, %v229_v10  ;;  %v330_v13 = vld [vmem:[%s569_s2] ss:$0 sm:$0xff]  ;;  %p441_p2 = scmp.ne.s32.totalorder %s321_s10, %s440_s11  ;;  %p446_p4 = scmp.lt.s32.totalorder %s440_s11, %s440_s11 }
  0x2c   :  { %378 = vmatpush3.bf16.msra.mxu1 %v377_v6  ;;  %v333_v21 = vld [vmem:[%s571_s4] ss:$0 sm:$0xff] }
  0x2d   :  { %379 = vmatprep.subr.bf16.mxu1 %v474_v1  ;;  %384 = vmatpush3.bf16.msra.mxu0 %v383_v12  ;;  %v335_v26 = vld [vmem:[%s573_s6] ss:$0 sm:$0xff]  ;;  %p447_p5 = por %p446_p4, %p445_p3 }
  0x2e   :  { %385 = vmatprep.subr.bf16.mxu0 %v474_v1 }
  0x2f   :  { %p448_p6 = pnand %p447_p5, %p441_p2 }
  0x30   :  { %381 = vmatpush3.bf16.msra.mxu1 %v380_v9 }
  0x31   :  { %387 = vmatpush3.bf16.msra.mxu0 %v386_v20 }
  0xfd   :  { %v138_v14 = vpop.f32.mrb[0].mxu0 }
  0xfe   :  { %v139_v15 = vadd.f32 %v330_v13, %v138_v14  ;;  %v353_v16 = vpop.f32.mrb[1].mxu0 }
 0x100   :  { %v142_v17 = vmax.f32 %v139_v15, 0.0 }
 0x102   :  { %363 = vmatmul.mubr.msk.f32.vlgmr.msra.gmra.mrb[0].mxu1 %vm154_vm3, %v142_v17 }
 0x1d5   :  { %v224_v22 = vpop.f32.mrb[0].mxu1 }
 0x1d6   :  { %v225_v23 = vadd.f32 %v333_v21, %v224_v22  ;;  %v364_v24 = vpop.f32.mrb[1].mxu1 }
 0x1d8   :  { %v228_v25 = vmax.f32 %v225_v23, 0.0 }
 0x1da   :  { %374 = vmatmul.mubr.msk.f32.vlgmr.msra.gmra.mrb[2].mxu0 %vm154_vm3, %v228_v25 }
 0x2ad   :  { %v309_v27 = vpop.f32.mrb[2].mxu0 }
 0x2ae   :  { %v310_v28 = vadd.f32 %v335_v26, %v309_v27  ;;  %v375_v29 = vpop.f32.mrb[3].mxu0 }
 0x2b0   :  { %313 = vst [vmem:[#allocation7] sm:$0xff] %v310_v28 }
 0x2b1   :  { %451 = shalt.err (!%p448_p6)
}
 0x2b2   :  { %s452_s13 = scalar_lea.hbm %s574_s7, 128 }
 0x2b3   :  { %p453_p7 = scmp.ne.s32.totalorder %s574_s7, %s452_s13  ;;  %p456_p8 = scmp.lt.u32.totalorder %s452_s13, %s574_s7 }
 0x2b5   :  { %p458_p9 = pnand %p456_p8, %p453_p7 }
 0x2b7   :  { %461 = shalt.err (!%p458_p9)
}
 0x2b8   :  { %323 = dma.vmem_to_hbm [thread:$0]  %s321_s10, 128, %s574_s7, [#allocation4]  }
 0x2b9   :  { %466 = dma.done.wait [#allocation4], 128  }
 0x2ba   :  { %467 = vsyncadd [#allocation4], 4294967168 }
 0x2bb   :  { %327 = vsyncpa [#allocation3], 1 }
 0x2bc   :  { %328 = vsyncpa [#allocation6], 1 }
 0x2bd   :  { %329 = vsyncpa [#allocation4], 1 }

</bundles_post_ra>
